<compile_context>
chip_gen: v7x
topology: tpu7x:2x2x1
jax: 0.10.0
libtpu: 0.0.40
codegen_flags: <defaults>
</compile_context>

<pallas_src>
import functools

import jax
import jax.numpy as jnp
from jax.experimental import pallas as pl
from jax.experimental.pallas import tpu as pltpu


_NEG_BIG = -1.0e30  # finite "-inf" stand-in: avoids inf-inf -> NaN on masked lanes


def _round_up(x, m):
    return ((x + m - 1) // m) * m


def _vmem_budget():
    """Return (max logits-block bytes, vmem_limit_bytes) for this TPU generation."""
    try:
        vmem_bytes = int(pltpu.get_tpu_info().vmem_capacity_bytes)
    except Exception:
        # Unknown / not queryable: be conservative (safe on every generation).
        vmem_bytes = 64 * 1024 * 1024
    if vmem_bytes >= 100 * 1024 * 1024:
        # v5e / v6e: 128 MiB physical VMEM -> big blocks, generous scoped limit.
        return 8 * 1024 * 1024, 96 * 1024 * 1024
    # v7x: 64 MiB physical VMEM; keep headroom for f32/int32 in-kernel temps.
    return 4 * 1024 * 1024, 48 * 1024 * 1024


def _pick_tiles(n, v, itemsize, max_block_bytes):
    """Choose (tile_n, tile_v): the largest logits block under the byte budget.

    Prefers tile_v == V (no vocab chunking).  Only when even 16 rows of the
    full vocab exceed the budget (huge vocab, mainly v7x) does it chunk V in
    multiples of 128 and rely on the in-kernel online log-sum-exp.
    """
    rows_full_v = max_block_bytes // max(1, v * itemsize)
    if rows_full_v >= 16:
        tile_v = v
        tile_n = min((rows_full_v // 16) * 16, _round_up(n, 16))
        tile_n = max(16, tile_n)
    else:
        tile_n = 16
        cols = max_block_bytes // (tile_n * itemsize)
        tile_v = max(128, (cols // 128) * 128)
        tile_v = min(tile_v, _round_up(v, 128))
    return tile_n, tile_v


def _awr_kernel(logits_ref, side_ref, out_ref, m_sc, s_sc, ll_sc, *,
                inv_beta, clip_weight_max, n_total, v_total, tile_n, tile_v):
    """Grid step (i, vj): one (tile_n, tile_v) logits slab.

    Online log-sum-exp over the vj (vocab-chunk) axis via VMEM scratch
    (running max m_sc, running sum s_sc, accumulated label logit ll_sc).
    On the last chunk the per-row CE is combined with the advantage weights
    and squared error, row-masked, and reduced into a lane-dense (1, 1, 128)
    partial-sum block (lane 0 = weighted CE sum, lane 1 = squared-error sum).
    """
    i = pl.program_id(0)
    vj = pl.program_id(1)
    nv = pl.num_programs(1)

    @pl.when(vj == 0)
    def _():
        m_sc[...] = jnp.full((tile_n, 1), _NEG_BIG, jnp.float32)
        s_sc[...] = jnp.zeros((tile_n, 1), jnp.float32)
        ll_sc[...] = jnp.zeros((tile_n, 1), jnp.float32)

    logits = logits_ref[...].astype(jnp.float32)          # (tile_n, tile_v)
    side = side_ref[...]                                   # (tile_n, 3) f32
    labels = side[:, 0:1].astype(jnp.int32)                # exact for V < 2^24

    col = vj * tile_v + jax.lax.broadcasted_iota(jnp.int32, (tile_n, tile_v), 1)
    if v_total % tile_v != 0:
        # Only the last V chunk has padded columns; mask them to -BIG so they
        # contribute exp(...) == 0 to the running sum.
        logits_m = jnp.where(col < v_total, logits, _NEG_BIG)
    else:
        logits_m = logits

    chunk_max = jnp.max(logits_m, axis=-1, keepdims=True)
    # Gather the label logit from the *original* tile (label < V always).
    label_hit = jnp.sum(jnp.where(col == labels, logits, 0.0),
                        axis=-1, keepdims=True)

    m_old = m_sc[...]
    m_new = jnp.maximum(m_old, chunk_max)
    s_sc[...] = (s_sc[...] * jnp.exp(m_old - m_new)
                 + jnp.sum(jnp.exp(logits_m - m_new), axis=-1, keepdims=True))
    ll_sc[...] = ll_sc[...] + label_hit
    m_sc[...] = m_new

    @pl.when(vj == nv - 1)
    def _():
        ts = side[:, 1:2]                                  # token_scores[..., 1:]
        vals = side[:, 2:3]                                # values[..., :-1]
        # CE = logsumexp(logits) - logits[label]
        lm_loss = jnp.log(s_sc[...]) + m_sc[...] - ll_sc[...]
        reward = -ts
        # values are detached in the torch code; forward value is identical.
        advantage = reward - vals
        # exp(.) >= 0, so torch clamp(min=0, max=clip_weight_max) is a minimum.
        weights = jnp.minimum(jnp.exp(advantage * inv_beta), clip_weight_max)
        sq_err = (reward - vals) * (reward - vals)

        w_term = lm_loss * weights
        v_term = sq_err
        if n_total % tile_n != 0:
            # NaN-safe mask of garbage tail rows (select, not multiply).
            row_ids = (i * tile_n
                       + jax.lax.broadcasted_iota(jnp.int32, (tile_n, 1), 0))
            valid = row_ids < n_total
            w_term = jnp.where(valid, w_term, 0.0)
            v_term = jnp.where(valid, v_term, 0.0)

        w_partial = jnp.sum(w_term)
        v_partial = jnp.sum(v_term)

        lane = jax.lax.broadcasted_iota(jnp.int32, out_ref.shape, 2)
        out_ref[...] = jnp.where(lane == 0, w_partial,
                                 jnp.where(lane == 1, v_partial, 0.0))


def awr_loss(logits, labels, token_scores, values, *,
             alpha=0.5, beta=1.0, clip_weight_max=1000.0,
             tile_n=None, tile_v=None):
    """Pallas implementation of AWR.forward (default config). Scalar loss.

    logits:       (N, V) float (any float dtype; bf16 stays bf16 into VMEM)
    labels:       (N,)   int
    token_scores: (B, T) float   -> shifted [..., 1:] flattened to (N,)
    values:       (B, T) float   -> shifted [..., :-1] flattened to (N,)
    with N = B * (T - 1).

    tile_v overrides must be a multiple of 128 or equal to V.
    """
    # TODO(synk): log_stats dict (pearsonr / wandb histograms), the
    # non-default branches (fixed_value, clip_value, normalize_advantage),
    # CrossEntropyLoss ignore_index, and a custom VJP (values.detach()
    # gradient semantics) are not implemented; forward value only.
    n, v = logits.shape
    ts_shifted = token_scores[..., 1:].reshape(-1).astype(jnp.float32)
    vals_shifted = values[..., :-1].reshape(-1).astype(jnp.float32)
    assert ts_shifted.shape[0] == n and vals_shifted.shape[0] == n
    # Pack labels (as f32, exact for V < 2^24) + shifted scores/values into a
    # single lane-dense side input: one DMA stream instead of three.
    side = jnp.stack(
        [labels.reshape(-1).astype(jnp.float32), ts_shifted, vals_shifted],
        axis=-1)                                              # (N, 3) f32

    max_block_bytes, vmem_limit = _vmem_budget()
    auto_tn, auto_tv = _pick_tiles(n, v, jnp.dtype(logits.dtype).itemsize,
                                   max_block_bytes)
    tile_n = auto_tn if tile_n is None else tile_n
    tile_v = auto_tv if tile_v is None else tile_v

    num_row_tiles = pl.cdiv(n, tile_n)
    num_v_chunks = pl.cdiv(v, tile_v)

    kernel = functools.partial(
        _awr_kernel,
        inv_beta=1.0 / float(beta),
        clip_weight_max=float(clip_weight_max),
        n_total=n, v_total=v, tile_n=tile_n, tile_v=tile_v)

    parts = pl.pallas_call(
        kernel,
        out_shape=jax.ShapeDtypeStruct((num_row_tiles, 1, 128), jnp.float32),
        grid_spec=pltpu.PrefetchScalarGridSpec(
            num_scalar_prefetch=0,
            grid=(num_row_tiles, num_v_chunks),
            in_specs=[
                # logits stream in their native dtype (bf16 stays bf16).
                pl.BlockSpec((tile_n, tile_v), lambda i, vj: (i, vj)),
                # packed labels / token_scores / values side input.
                pl.BlockSpec((tile_n, 3), lambda i, vj: (i, 0)),
            ],
            out_specs=pl.BlockSpec((1, 1, 128), lambda i, vj: (i, 0, 0)),
            scratch_shapes=[pltpu.VMEM((tile_n, 1), jnp.float32)] * 3,
        ),
        compiler_params=pltpu.CompilerParams(
            dimension_semantics=("parallel", "arbitrary"),
            vmem_limit_bytes=vmem_limit,
        ),
    )(logits, side)

    inv_n = 1.0 / float(n)
    weighted_lm_loss = jnp.sum(parts[:, 0, 0]) * inv_n
    value_loss = jnp.sum(parts[:, 0, 1]) * inv_n
    return alpha * weighted_lm_loss + (1.0 - alpha) * value_loss


def _awr_loss_ref(logits, labels, token_scores, values, *,
                  alpha=0.5, beta=1.0, clip_weight_max=1000.0):
    """Plain-JAX reference matching the PyTorch forward (default flags)."""
    ts_shifted = token_scores[..., 1:].reshape(-1)
    vals_shifted = values[..., :-1].reshape(-1)
    reward = -ts_shifted
    advantage = reward - jax.lax.stop_gradient(vals_shifted)
    logp = jax.nn.log_softmax(logits.astype(jnp.float32), axis=-1)
    lm_loss = -jnp.take_along_axis(logp, labels[:, None], axis=-1)[:, 0]
    weights = jnp.clip(jnp.exp(advantage / beta), 0.0, clip_weight_max)
    weighted_lm_loss = jnp.mean(lm_loss * weights)
    value_loss = jnp.mean((reward - vals_shifted) ** 2)
    return alpha * weighted_lm_loss + (1.0 - alpha) * value_loss


if __name__ == "__main__":
    # Small shapes implied by the forward: B sequences of length T,
    # flattened N = B*(T-1) token positions, vocab V.
    B, T, V = 2, 9, 256
    N = B * (T - 1)  # 16

    key = jax.random.PRNGKey(0)
    k1, k2, k3, k4 = jax.random.split(key, 4)
    logits_f32 = jax.random.normal(k1, (N, V), dtype=jnp.float32)
    labels = jax.random.randint(k2, (N,), 0, V, dtype=jnp.int32)
    # token_scores in [-1, 0] (negative rewards), values roughly matching.
    token_scores = -jax.random.uniform(k3, (B, T), dtype=jnp.float32)
    values = -jax.random.uniform(k4, (B, T), dtype=jnp.float32)

    ref = _awr_loss_ref(logits_f32, labels, token_scores, values)

    # 1) f32 logits, auto tiling (single V chunk).
    loss = jax.block_until_ready(awr_loss(logits_f32, labels, token_scores, values))
    assert jnp.allclose(loss, ref, atol=1e-4, rtol=1e-4), (loss, ref)

    # 2) bf16 logits fed to the kernel in native bf16 (no host upcast).
    logits_bf16 = logits_f32.astype(jnp.bfloat16)
    loss_bf = jax.block_until_ready(awr_loss(logits_bf16, labels, token_scores, values))
    ref_bf = _awr_loss_ref(logits_bf16, labels, token_scores, values)
    assert jnp.allclose(loss_bf, ref_bf, atol=1e-3, rtol=1e-3), (loss_bf, ref_bf)

    # 3) Forced vocab chunking: exercises the online log-sum-exp path (2 chunks).
    loss_vc = jax.block_until_ready(
        awr_loss(logits_f32, labels, token_scores, values, tile_v=128))
    assert jnp.allclose(loss_vc, ref, atol=1e-4, rtol=1e-4), (loss_vc, ref)

    # 4) Ragged N (21 rows) and ragged V (320 with tile_v=128): exercises both
    #    the row mask (no host padding anymore) and the last-chunk column mask.
    B2, T2, V2 = 3, 8, 320
    N2 = B2 * (T2 - 1)  # 21
    k5, k6, k7, k8 = jax.random.split(jax.random.PRNGKey(0), 4)
    logits2 = jax.random.normal(k5, (N2, V2), dtype=jnp.float32)
    labels2 = jax.random.randint(k6, (N2,), 0, V2, dtype=jnp.int32)
    scores2 = -jax.random.uniform(k7, (B2, T2), dtype=jnp.float32)
    values2 = -jax.random.uniform(k8, (B2, T2), dtype=jnp.float32)
    ref2 = _awr_loss_ref(logits2, labels2, scores2, values2)
    loss2 = jax.block_until_ready(
        awr_loss(logits2, labels2, scores2, values2, tile_v=128))
    assert jnp.allclose(loss2, ref2, atol=1e-4, rtol=1e-4), (loss2, ref2)

    print("KERNEL_OK")
</pallas_src>

<mosaic_0001>
module attributes {stable_mosaic.version = 11 : i64} {
  func.func @_awr_kernel(%arg0: i32, %arg1: i32, %arg2: memref<16x256xf32, #tpu.memory_space<vmem>>, %arg3: memref<16x3xf32, #tpu.memory_space<vmem>>, %arg4: memref<1x1x128xf32, #tpu.memory_space<vmem>>, %arg5: memref<16x1xf32, #tpu.memory_space<vmem>>, %arg6: memref<16x1xf32, #tpu.memory_space<vmem>>, %arg7: memref<16x1xf32, #tpu.memory_space<vmem>>) attributes {dimension_semantics = [#tpu.dimension_semantics<parallel>, #tpu.dimension_semantics<arbitrary>], iteration_bounds = array<i64: 1, 1>, scalar_prefetch = 0 : i64, scratch_operands = 3 : i64, tpu.core_type = #tpu.core_type<tc>, window_params = [{transform_indices = @transform_0, window_bounds = array<i64: 16, 256>}, {transform_indices = @transform_1, window_bounds = array<i64: 16, 3>}, {transform_indices = @transform_2, window_bounds = array<i64: 1, 1, 128>}]} {
    %c0_i32 = arith.constant 0 : i32
    %0 = arith.cmpi eq, %arg1, %c0_i32 : i32
    %1 = arith.extui %0 : i1 to i32
    %c0_i32_0 = arith.constant 0 : i32
    %2 = arith.cmpi ne, %1, %c0_i32_0 : i32
    scf.if %2 {
      %cst_21 = arith.constant -1.000000e+30 : f32
      %39 = vector.broadcast %cst_21 : f32 to vector<16x1xf32>
      %c0_22 = arith.constant 0 : index
      %c0_23 = arith.constant 0 : index
      %40 = vector.load %arg5[%c0_22, %c0_23] : memref<16x1xf32, #tpu.memory_space<vmem>>, vector<16x1xf32>
      tpu.vector_store %arg5[%c0_22, %c0_23], %39 {strides = array<i32>} : memref<16x1xf32, #tpu.memory_space<vmem>>, vector<16x1xf32>,
      %cst_24 = arith.constant 0.000000e+00 : f32
      %41 = vector.broadcast %cst_24 : f32 to vector<16x1xf32>
      %c0_25 = arith.constant 0 : index
      %c0_26 = arith.constant 0 : index
      %42 = vector.load %arg6[%c0_25, %c0_26] : memref<16x1xf32, #tpu.memory_space<vmem>>, vector<16x1xf32>
      tpu.vector_store %arg6[%c0_25, %c0_26], %41 {strides = array<i32>} : memref<16x1xf32, #tpu.memory_space<vmem>>, vector<16x1xf32>,
      %cst_27 = arith.constant 0.000000e+00 : f32
      %43 = vector.broadcast %cst_27 : f32 to vector<16x1xf32>
      %c0_28 = arith.constant 0 : index
      %c0_29 = arith.constant 0 : index
      %44 = vector.load %arg7[%c0_28, %c0_29] : memref<16x1xf32, #tpu.memory_space<vmem>>, vector<16x1xf32>
      tpu.vector_store %arg7[%c0_28, %c0_29], %43 {strides = array<i32>} : memref<16x1xf32, #tpu.memory_space<vmem>>, vector<16x1xf32>,
    } else {
    }
    %c0 = arith.constant 0 : index
    %c0_1 = arith.constant 0 : index
    %3 = vector.load %arg2[%c0, %c0_1] : memref<16x256xf32, #tpu.memory_space<vmem>>, vector<16x256xf32>
    %c0_2 = arith.constant 0 : index
    %c0_3 = arith.constant 0 : index
    %4 = vector.load %arg3[%c0_2, %c0_3] : memref<16x3xf32, #tpu.memory_space<vmem>>, vector<16x3xf32>
    %5 = vector.extract_strided_slice %4 {offsets = [0, 0], sizes = [16, 1], strides = [1, 1]} : vector<16x3xf32> to vector<16x1xf32>
    %6 = arith.fptosi %5 : vector<16x1xf32> to vector<16x1xi32>
    %c256_i32 = arith.constant 256 : i32
    %7 = arith.muli %arg1, %c256_i32 : i32
    %8 = tpu.iota {dimensions = array<i32: 1>} : vector<16x256xi32>
    %9 = vector.broadcast %7 : i32 to vector<16x256xi32>
    %10 = arith.addi %9, %8 : vector<16x256xi32>
    %cst = arith.constant dense<0xFF800000> : vector<16xf32>
    %11 = vector.multi_reduction <maximumf>, %3, %cst [1] : vector<16x256xf32> to vector<16xf32>
    %12 = vector.shape_cast %11 : vector<16xf32> to vector<16x1xf32>
    %13 = vector.broadcast %6 : vector<16x1xi32> to vector<16x256xi32>
    %14 = arith.cmpi eq, %10, %13 : vector<16x256xi32>
    %cst_4 = arith.constant 0.000000e+00 : f32
    %15 = vector.broadcast %cst_4 : f32 to vector<16x256xf32>
    %16 = arith.select %14, %3, %15 : vector<16x256xi1>, vector<16x256xf32>
    %cst_5 = arith.constant dense<0.000000e+00> : vector<16xf32>
    %17 = vector.multi_reduction <add>, %16, %cst_5 [1] : vector<16x256xf32> to vector<16xf32>
    %18 = vector.shape_cast %17 : vector<16xf32> to vector<16x1xf32>
    %c0_6 = arith.constant 0 : index
    %c0_7 = arith.constant 0 : index
    %19 = vector.load %arg5[%c0_6, %c0_7] : memref<16x1xf32, #tpu.memory_space<vmem>>, vector<16x1xf32>
    %20 = arith.maximumf %19, %12 : vector<16x1xf32>
    %c0_8 = arith.constant 0 : index
    %c0_9 = arith.constant 0 : index
    %21 = vector.load %arg6[%c0_8, %c0_9] : memref<16x1xf32, #tpu.memory_space<vmem>>, vector<16x1xf32>
    %22 = arith.subf %19, %20 : vector<16x1xf32>
    %23 = math.exp %22 : vector<16x1xf32>
    %24 = arith.mulf %21, %23 : vector<16x1xf32>
    %25 = vector.broadcast %20 : vector<16x1xf32> to vector<16x256xf32>
    %26 = arith.subf %3, %25 : vector<16x256xf32>
    %27 = math.exp %26 : vector<16x256xf32>
    %cst_10 = arith.constant dense<0.000000e+00> : vector<16xf32>
    %28 = vector.multi_reduction <add>, %27, %cst_10 [1] : vector<16x256xf32> to vector<16xf32>
    %29 = vector.shape_cast %28 : vector<16xf32> to vector<16x1xf32>
    %30 = arith.addf %24, %29 : vector<16x1xf32>
    %c0_11 = arith.constant 0 : index
    %c0_12 = arith.constant 0 : index
    %31 = vector.load %arg6[%c0_11, %c0_12] : memref<16x1xf32, #tpu.memory_space<vmem>>, vector<16x1xf32>
    tpu.vector_store %arg6[%c0_11, %c0_12], %30 {strides = array<i32>} : memref<16x1xf32, #tpu.memory_space<vmem>>, vector<16x1xf32>,
    %c0_13 = arith.constant 0 : index
    %c0_14 = arith.constant 0 : index
    %32 = vector.load %arg7[%c0_13, %c0_14] : memref<16x1xf32, #tpu.memory_space<vmem>>, vector<16x1xf32>
    %33 = arith.addf %32, %18 : vector<16x1xf32>
    %c0_15 = arith.constant 0 : index
    %c0_16 = arith.constant 0 : index
    %34 = vector.load %arg7[%c0_15, %c0_16] : memref<16x1xf32, #tpu.memory_space<vmem>>, vector<16x1xf32>
    tpu.vector_store %arg7[%c0_15, %c0_16], %33 {strides = array<i32>} : memref<16x1xf32, #tpu.memory_space<vmem>>, vector<16x1xf32>,
    %c0_17 = arith.constant 0 : index
    %c0_18 = arith.constant 0 : index
    %35 = vector.load %arg5[%c0_17, %c0_18] : memref<16x1xf32, #tpu.memory_space<vmem>>, vector<16x1xf32>
    tpu.vector_store %arg5[%c0_17, %c0_18], %20 {strides = array<i32>} : memref<16x1xf32, #tpu.memory_space<vmem>>, vector<16x1xf32>,
    %c0_i32_19 = arith.constant 0 : i32
    %36 = arith.cmpi eq, %arg1, %c0_i32_19 : i32
    %37 = arith.extui %36 : i1 to i32
    %c0_i32_20 = arith.constant 0 : i32
    %38 = arith.cmpi ne, %37, %c0_i32_20 : i32
    scf.if %38 {
      %39 = vector.extract_strided_slice %4 {offsets = [0, 1], sizes = [16, 1], strides = [1, 1]} : vector<16x3xf32> to vector<16x1xf32>
      %40 = vector.extract_strided_slice %4 {offsets = [0, 2], sizes = [16, 1], strides = [1, 1]} : vector<16x3xf32> to vector<16x1xf32>
      %c0_21 = arith.constant 0 : index
      %c0_22 = arith.constant 0 : index
      %41 = vector.load %arg6[%c0_21, %c0_22] : memref<16x1xf32, #tpu.memory_space<vmem>>, vector<16x1xf32>
      %42 = math.log %41 : vector<16x1xf32>
      %c0_23 = arith.constant 0 : index
      %c0_24 = arith.constant 0 : index
      %43 = vector.load %arg5[%c0_23, %c0_24] : memref<16x1xf32, #tpu.memory_space<vmem>>, vector<16x1xf32>
      %44 = arith.addf %42, %43 : vector<16x1xf32>
      %c0_25 = arith.constant 0 : index
      %c0_26 = arith.constant 0 : index
      %45 = vector.load %arg7[%c0_25, %c0_26] : memref<16x1xf32, #tpu.memory_space<vmem>>, vector<16x1xf32>
      %46 = arith.subf %44, %45 : vector<16x1xf32>
      %cst_27 = arith.constant 0.000000e+00 : f32
      %47 = vector.broadcast %cst_27 : f32 to vector<16x1xf32>
      %48 = arith.subf %47, %39 : vector<16x1xf32>
      %49 = arith.subf %48, %40 : vector<16x1xf32>
      %cst_28 = arith.constant 1.000000e+00 : f32
      %50 = vector.broadcast %cst_28 : f32 to vector<16x1xf32>
      %51 = arith.mulf %49, %50 : vector<16x1xf32>
      %52 = math.exp %51 : vector<16x1xf32>
      %cst_29 = arith.constant 1.000000e+03 : f32
      %53 = vector.broadcast %cst_29 : f32 to vector<16x1xf32>
      %54 = arith.minimumf %52, %53 : vector<16x1xf32>
      %55 = arith.subf %48, %40 : vector<16x1xf32>
      %56 = arith.subf %48, %40 : vector<16x1xf32>
      %57 = arith.mulf %55, %56 : vector<16x1xf32>
      %58 = arith.mulf %46, %54 : vector<16x1xf32>
      %59 = vector.shape_cast %58 : vector<16x1xf32> to vector<1x16x1xf32>
      %cst_30 = arith.constant dense<0.000000e+00> : vector<1xf32>
      %60 = vector.multi_reduction <add>, %59, %cst_30 [1, 2] : vector<1x16x1xf32> to vector<1xf32>
      %61 = vector.shape_cast %60 : vector<1xf32> to vector<1x1x1xf32>
      %62 = vector.extract %61[0, 0, 0] : f32 from vector<1x1x1xf32>
      %63 = vector.shape_cast %57 : vector<16x1xf32> to vector<1x16x1xf32>
      %cst_31 = arith.constant dense<0.000000e+00> : vector<1xf32>
      %64 = vector.multi_reduction <add>, %63, %cst_31 [1, 2] : vector<1x16x1xf32> to vector<1xf32>
      %65 = vector.shape_cast %64 : vector<1xf32> to vector<1x1x1xf32>
      %66 = vector.extract %65[0, 0, 0] : f32 from vector<1x1x1xf32>
      %67 = tpu.iota {dimensions = array<i32: 2>} : vector<1x1x128xi32>
      %c0_i32_32 = arith.constant 0 : i32
      %68 = vector.broadcast %c0_i32_32 : i32 to vector<1x1x128xi32>
      %69 = arith.cmpi eq, %67, %68 : vector<1x1x128xi32>
      %c1_i32 = arith.constant 1 : i32
      %70 = vector.broadcast %c1_i32 : i32 to vector<1x1x128xi32>
      %71 = arith.cmpi eq, %67, %70 : vector<1x1x128xi32>
      %cst_33 = arith.constant 0.000000e+00 : f32
      %72 = vector.broadcast %66 : f32 to vector<1x1x128xf32>
      %73 = vector.broadcast %cst_33 : f32 to vector<1x1x128xf32>
      %74 = arith.select %71, %72, %73 : vector<1x1x128xi1>, vector<1x1x128xf32>
      %75 = vector.broadcast %62 : f32 to vector<1x1x128xf32>
      %76 = arith.select %69, %75, %74 : vector<1x1x128xi1>, vector<1x1x128xf32>
      %c0_34 = arith.constant 0 : index
      %c0_35 = arith.constant 0 : index
      %c0_36 = arith.constant 0 : index
      %77 = vector.load %arg4[%c0_34, %c0_35, %c0_36] : memref<1x1x128xf32, #tpu.memory_space<vmem>>, vector<1x1x128xf32>
      tpu.vector_store %arg4[%c0_34, %c0_35, %c0_36], %76 {strides = array<i32>} : memref<1x1x128xf32, #tpu.memory_space<vmem>>, vector<1x1x128xf32>,
    } else {
    }
    return
  }
  func.func @transform_0(%arg0: i32, %arg1: i32) -> (i32, i32) {
    %c0_i32 = arith.constant 0 : i32
    return %arg0, %arg1 : i32, i32
  }
  func.func @transform_1(%arg0: i32, %arg1: i32) -> (i32, i32) {
    %c0_i32 = arith.constant 0 : i32
    %c0_i32_0 = arith.constant 0 : i32
    return %arg0, %c0_i32 : i32, i32
  }
  func.func @transform_2(%arg0: i32, %arg1: i32) -> (i32, i32, i32) {
    %c0_i32 = arith.constant 0 : i32
    %c0_i32_0 = arith.constant 0 : i32
    %c0_i32_1 = arith.constant 0 : i32
    return %arg0, %c0_i32, %c0_i32_0 : i32, i32, i32
  }
}

</mosaic_0001>

<bundles_post_ra>
// kernel: tpu_custom_call.1
= control target key start
LH: loop header
LB: loop body
LE: loop exit
PB: predicated region body
PF: predicated region fallthrough
CT: control target
= control target key end

     0   :  { %7 = vsyncpa [#allocation6], 0  ;;  %s436_s0 = inlined_call_operand.hbm [shape: f32[16,256], index: 0, kind: input, shape index: {}]   ;;  %s437_s1 = inlined_call_operand.vmem [shape: f32[16,3], index: 1, kind: input, shape index: {}]   ;;  %s438_s2 = inlined_call_operand.hbm [shape: f32[1,1,128], index: 2, kind: output, shape index: {}]  }
   0x1   :  { %8 = vsyncpa [#allocation7], 0  ;;  %s320_s9 = smov [#allocation5]   ;;  %s272_s13 = scalar_lea.hbm %s436_s0, 512 }
   0x2   :  { %s14_s10 = sshll.u32 %s320_s9, 4  ;;  %p273_p0 = scmp.ne.s32.totalorder %s436_s0, %s272_s13  ;;  %s15_s10 = int_to_ptr.vmem [resolvable:$true] %s14_s10 }
   0x3   :  { %p276_p1 = scmp.lt.u32.totalorder %s272_s13, %s436_s0 }
   0x5   :  { %p278_p2 = pnand %p276_p1, %p273_p0 }
   0x7   :  { %281 = shalt.err (!%p278_p2)
}
   0x8   :  { %s282_s18 = scalar_lea.vmem %s15_s10, 512  ;;  %p287_p4 = scmp.lt.s32.totalorder %s15_s10, %s15_s10 }
   0x9   :  { %p283_p3 = scmp.ne.s32.totalorder %s15_s10, %s282_s18  ;;  %p288_p5 = scmp.lt.s32.totalorder %s282_s18, %s282_s18 }
   0xb   :  { %p289_p6 = por %p288_p5, %p287_p4 }
   0xd   :  { %p290_p7 = pnand %p289_p6, %p283_p3 }
   0xf   :  { %293 = shalt.err (!%p290_p7)
}
  0x10   :  { %s321_s19 = smov 256   ;;  %s322_s20 = smov 16  }
  0x11   :  { %20 = dma.hbm_to_vmem [thread:$0]  %s436_s0, 512, %s15_s10, [#allocation6], %s321_s19, %s321_s19, %s322_s20  }
  0x12   :  { %316 = dma.done.wait [#allocation6], 512  }
  0x13   :  { %317 = vsyncadd [#allocation6], 4294966784  ;;  %vm30_vm0 = vcmask 7168   ;;  %v323_v0 = vmov -1e+30   ;;  %v37_v1 = vld [vmem:[#allocation5] sm:$0xff]  ;;  %v46_v26 = vlaneseq }
  0x14   :  { %31 = vst.msk [vmem:[#allocation2] sm:$0xff] %vm30_vm0, %v323_v0  ;;  %32 = vst.msk [vmem:[#allocation2 + $0x8] sm:$0xff] %vm30_vm0, %v323_v0  ;;  %v38_v2 = vld [vmem:[#allocation5 + $0x8] sm:$0xff]  ;;  %v357_v3 = vld [vmem:[#allocation5 + $0x10] sm:$0xff]  ;;  %v324_v7 = vmov 0   ;;  %v325_v9 = vmov 0.0  }
  0x15   :  { %v52_v4 = vmax.f32 %v37_v1, %v38_v2  ;;  %v359_v5 = vld [vmem:[#allocation5 + $0x18] sm:$0xff]  ;;  %250 = vset.pattern.permute.xlu1 %v324_v7  ;;  %251 = vset.pattern.permute.xlu0 %v324_v7  ;;  %v41_v8 = vld [vmem:[%s437_s1] sm:$0xff]  ;;  %33 = vst.msk [vmem:[#allocation3] sm:$0xff] %vm30_vm0, %v325_v9  ;;  %34 = vst.msk [vmem:[#allocation3 + $0x8] sm:$0xff] %vm30_vm0, %v325_v9  ;;  %v397_v32 = vand.u32 127, %v46_v26  ;;  %s327_s27 = smov [#allocation8]  }
  0x16   :  { %v55_v6 = vmax.f32 %v357_v3, %v359_v5  ;;  %35 = vst.msk [vmem:[#allocation4] sm:$0xff] %vm30_vm0, %v325_v9  ;;  %36 = vst.msk [vmem:[#allocation4 + $0x8] sm:$0xff] %vm30_vm0, %v325_v9  ;;  %v234_v10 = vtrunc.f32 %v41_v8  ;;  %v42_v14 = vld [vmem:[%s437_s1 + $0x8] sm:$0xff]  ;;  %s326_s1 = smov 127   ;;  %v150_v42 = vsub.f32 0.0, %v41_v8  ;;  %s225_s28 = sshll.u32 %s327_s27, 4  ;;  %s226_s28 = int_to_ptr.vmem [resolvable:$true] %s225_s28 }
  0x17   :  { %53 = vmax.xlane.f32.xlu0 %v52_v4  ;;  %v236_v18 = vtrunc.f32 %v42_v14  ;;  %v48_v36 = vadd.s32 128, %v397_v32  ;;  %v151_v48 = vsub.f32 0.0, %v42_v14  ;;  %vm213_vm5 = vcmp.eq.s32.totalorder %v397_v32, 1  ;;  %s294_s30 = scalar_lea.vmem %s226_s28, 16  ;;  %s298_s3 = scalar_lea.vmem %s226_s28, 32 }
  0x18   :  { %v235_v11 = vcvt.f32.s32 %v234_v10  ;;  %vm212_vm6 = vcmp.eq.s32.totalorder %v397_v32, 0  ;;  %p295_p8 = scmp.ne.s32.totalorder %s226_s28, %s294_s30  ;;  %p299_p9 = scmp.lt.s32.totalorder %s226_s28, %s226_s28 }
  0x19   :  { %v237_v22 = vcvt.f32.s32 %v236_v18  ;;  %p300_p10 = scmp.lt.s32.totalorder %s298_s3, %s294_s30 }
  0x1b   :  { %56 = vmax.xlane.f32.xlu0 %v55_v6  ;;  %v370_v12 = vld [vmem:[#allocation2] sm:$0xff]  ;;  %v378_v16 = vld [vmem:[#allocation2 + $0x8] sm:$0xff]  ;;  %p301_p11 = por %p300_p10, %p299_p9 }
  0x1c   :  { %v83_v7 = vld [vmem:[#allocation3 + $0x8] sm:$0xff] }
  0x1d   :  { %v125_v9 = vld [vmem:[#allocation4] sm:$0xff]  ;;  %p302_p12 = pnand %p301_p11, %p295_p8 }
  0x31   :  { %59 = vperm.xlu0 %251, %v235_v11  }
  0xa4   :  { %v54_v13 = vpop.xlane.xlu0 %53 }
  0xa5   :  { %v376_v15 = vmax.f32 %v370_v12, %v54_v13 }
  0xa7   :  { %v84_v17 = vsub.f32 %v370_v12, %v376_v15  ;;  %131 = vst.msk [vmem:[#allocation2] sm:$0xff] %vm30_vm0, %v376_v15  ;;  %94 = vperm.xlu1 %250, %v376_v15   ;;  %v126_v15 = vld [vmem:[#allocation4 + $0x8] sm:$0xff] }
  0xa8   :  { %v57_v19 = vpop.xlane.xlu0 %56 }
  0xa9   :  { %v386_v20 = vmax.f32 %v378_v16, %v57_v19  ;;  %v86_v0 = vmul.f32 1.442695, %v84_v17 }
  0xab   :  { %v85_v21 = vsub.f32 %v378_v16, %v386_v20  ;;  %132 = vst.msk [vmem:[#allocation2 + $0x8] sm:$0xff] %vm30_vm0, %v386_v20  ;;  %99 = vperm.xlu1 %250, %v386_v20  }
  0xaf   :  { %62 = vperm.xlu1 %250, %v237_v22  }
  0xb0   :  { %v60_v35 = vpop.permute.xlu0 %59 }
  0xb1   :  { %vm64_vm1 = vcmp.eq.s32.totalorder %v397_v32, %v60_v35  ;;  %vm65_vm2 = vcmp.eq.s32.totalorder %v48_v36, %v60_v35 }
  0xb2   :  { %v68_v40 = vsel %vm64_vm1, %v37_v1, 0.0  ;;  %v69_v41 = vsel %vm65_vm2, %v38_v2, 0.0 }
  0xb3   :  { %154 = vrot.lane.b32.xlu1 %v41_v8, %s326_s1  ;;  %v72_v45 = vadd.f32 %v69_v41, %v68_v40 }
  0xb7   :  { %156 = vrot.lane.b32.xlu1 %v42_v14, %s326_s1 }
 0x126   :  { %v95_v23 = vpop.permute.xlu1 %94 }
 0x127   :  { %v102_v24 = vsub.f32 %v37_v1, %v95_v23  ;;  %v103_v25 = vsub.f32 %v38_v2, %v95_v23  ;;  %v88_v1 = vmul.f32 1.442695, %v85_v21 }
 0x129   :  { %v106_v27 = vmul.f32 1.442695, %v102_v24  ;;  %v108_v28 = vmul.f32 1.442695, %v103_v25 }
 0x12a   :  { %v100_v29 = vpop.permute.xlu1 %99 }
 0x12b   :  { %252 = vpow2.f32 %v106_v27  ;;  %v104_v30 = vsub.f32 %v357_v3, %v100_v29  ;;  %v105_v31 = vsub.f32 %v359_v5, %v100_v29 }
 0x12c   :  { %254 = vpow2.f32 %v108_v28 }
 0x12d   :  { %v110_v33 = vmul.f32 1.442695, %v104_v30  ;;  %v112_v34 = vmul.f32 1.442695, %v105_v31  ;;  %v142_v30 = vld [vmem:[#allocation2] sm:$0xff] }
 0x12e   :  { %v63_v37 = vpop.permute.xlu1 %62 }
 0x12f   :  { %256 = vpow2.f32 %v110_v33  ;;  %vm66_vm3 = vcmp.eq.s32.totalorder %v397_v32, %v63_v37  ;;  %vm67_vm4 = vcmp.eq.s32.totalorder %v48_v36, %v63_v37  ;;  %v143_v36 = vld [vmem:[#allocation2 + $0x8] sm:$0xff] }
 0x130   :  { %258 = vpow2.f32 %v112_v34  ;;  %v70_v52 = vsel %vm66_vm3, %v357_v3, 0.0  ;;  %v71_v53 = vsel %vm67_vm4, %v359_v5, 0.0  ;;  %v82_v3 = vld [vmem:[#allocation3] sm:$0xff] }
 0x131   :  { %v75_v56 = vadd.f32 %v71_v53, %v70_v52 }
 0x132   :  { %v155_v38 = vpop.permute.xlu1 %154 }
 0x133   :  { %v160_v47 = vsub.f32 %v150_v42, %v155_v38 }
 0x135   :  { %v253_v39 = vpop.eup %252  ;;  %v162_v54 = vmul.f32 1.442695, %v160_v47  ;;  %v168_v61 = vmul.f32 %v160_v47, %v160_v47 }
 0x136   :  { %v255_v43 = vpop.eup %254  ;;  %v157_v50 = vpop.permute.xlu1 %156 }
 0x137   :  { %v114_v44 = vadd.f32 %v255_v43, %v253_v39  ;;  %v161_v55 = vsub.f32 %v151_v48, %v157_v50  ;;  %260 = vpow2.f32 %v162_v54 }
 0x139   :  { %v257_v46 = vpop.eup %256  ;;  %115 = vadd.xlane.f32.xlu1 %v114_v44  ;;  %v164_v57 = vmul.f32 1.442695, %v161_v55  ;;  %v169_v63 = vmul.f32 %v161_v55, %v161_v55 }
 0x13a   :  { %v259_v49 = vpop.eup %258 }
 0x13b   :  { %v117_v51 = vadd.f32 %v259_v49, %v257_v46  ;;  %262 = vpow2.f32 %v164_v57 }
 0x13c   :  { %264 = vpow2.f32 %v86_v0 }
 0x13d   :  { %73 = vadd.xlane.f32.xlu1 %v72_v45  ;;  %118 = vadd.xlane.f32.xlu0 %v117_v51  ;;  %266 = vpow2.f32 %v88_v1 }
 0x141   :  { %76 = vadd.xlane.f32.xlu1 %v75_v56  ;;  %v261_v58 = vpop.eup %260 }
 0x142   :  { %v166_v59 = vmin.f32 %v261_v58, 1000.0 }
 0x145   :  { %v263_v60 = vpop.eup %262 }
 0x146   :  { %v167_v62 = vmin.f32 %v263_v60, 1000.0  ;;  %v265_v2 = vpop.eup %264 }
 0x147   :  { %v90_v4 = vmul.f32 %v265_v2, %v82_v3  ;;  %v267_v5 = vpop.eup %266 }
 0x148   :  { %v91_v10 = vmul.f32 %v267_v5, %v83_v7 }
 0x152   :  { %172 = vrot.lane.b32.xlu1 %v166_v59, %s326_s1 }
 0x153   :  { %194 = vrot.lane.b32.xlu0 %v168_v61, %s326_s1 }
 0x156   :  { %174 = vrot.lane.b32.xlu1 %v167_v62, %s326_s1 }
 0x15a   :  { %196 = vrot.lane.b32.xlu1 %v169_v63, %s326_s1 }
 0x1c6   :  { %v116_v6 = vpop.xlane.xlu1 %115 }
 0x1c7   :  { %v120_v8 = vadd.f32 %v116_v6, %v90_v4 }
 0x1c9   :  { %123 = vst.msk [vmem:[#allocation3] sm:$0xff] %vm30_vm0, %v120_v8 }
 0x1ca   :  { %v119_v11 = vpop.xlane.xlu0 %118  ;;  %v74_v12 = vpop.xlane.xlu1 %73 }
 0x1cb   :  { %v121_v13 = vadd.f32 %v119_v11, %v91_v10  ;;  %v127_v14 = vadd.f32 %v125_v9, %v74_v12 }
 0x1cd   :  { %124 = vst.msk [vmem:[#allocation3 + $0x8] sm:$0xff] %vm30_vm0, %v121_v13  ;;  %129 = vst.msk [vmem:[#allocation4] sm:$0xff] %vm30_vm0, %v127_v14 }
 0x1ce   :  { %v77_v16 = vpop.xlane.xlu1 %76  ;;  %v195_v22 = vpop.permute.xlu0 %194 }
 0x1cf   :  { %v128_v17 = vadd.f32 %v126_v15, %v77_v16  ;;  %v200_v25 = vsel %vm30_vm0, %v195_v22, 0.0 }
 0x1d0   :  { %v136_v18 = vld [vmem:[#allocation3] sm:$0xff] }
 0x1d1   :  { %130 = vst.msk [vmem:[#allocation4 + $0x8] sm:$0xff] %vm30_vm0, %v128_v17  ;;  %268 = vlog2.f32 %v136_v18 }
 0x1d2   :  { %v173_v19 = vpop.permute.xlu1 %172 }
 0x1d4   :  { %v137_v20 = vld [vmem:[#allocation3 + $0x8] sm:$0xff]  ;;  %v146_v29 = vld [vmem:[#allocation4] sm:$0xff] }
 0x1d5   :  { %270 = vlog2.f32 %v137_v20 }
 0x1d6   :  { %v175_v21 = vpop.permute.xlu1 %174 }
 0x1d8   :  { %v147_v38 = vld [vmem:[#allocation4 + $0x8] sm:$0xff] }
 0x1da   :  { %v197_v23 = vpop.permute.xlu1 %196 }
 0x1db   :  { %v269_v24 = vpop.eup %268  ;;  %v201_v26 = vsel %vm30_vm0, %v197_v23, 0.0 }
 0x1dc   :  { %v139_v27 = vmul.f32 0.6931472, %v269_v24  ;;  %v202_v28 = vadd.f32 %v201_v26, %v200_v25 }
 0x1de   :  { %v144_v31 = vadd.f32 %v142_v30, %v139_v27  ;;  %203 = vadd.xlane.f32.xlu0 %v202_v28 }
 0x1df   :  { %v271_v33 = vpop.eup %270 }
 0x1e0   :  { %v148_v34 = vsub.f32 %v144_v31, %v146_v29  ;;  %v141_v35 = vmul.f32 0.6931472, %v271_v33 }
 0x1e2   :  { %v145_v37 = vadd.f32 %v143_v36, %v141_v35  ;;  %v178_v39 = vmul.f32 %v173_v19, %v148_v34 }
 0x1e4   :  { %v149_v40 = vsub.f32 %v145_v37, %v147_v38  ;;  %v180_v42 = vsel %vm30_vm0, %v178_v39, 0.0 }
 0x1e6   :  { %v179_v41 = vmul.f32 %v175_v21, %v149_v40 }
 0x1e8   :  { %v181_v43 = vsel %vm30_vm0, %v179_v41, 0.0 }
 0x1e9   :  { %v182_v44 = vadd.f32 %v181_v43, %v180_v42 }
 0x1eb   :  { %183 = vadd.xlane.f32.xlu1 %v182_v44 }
 0x26b   :  { %v204_v45 = vpop.xlane.xlu0 %203 }
 0x26c   :  { %v205_v46 = vrot.slane %v204_v45, 4 }
 0x26e   :  { %v206_v47 = vadd.f32 %v205_v46, %v204_v45 }
 0x270   :  { %v207_v48 = vrot.slane %v206_v47, 2 }
 0x272   :  { %v208_v52 = vadd.f32 %v207_v48, %v206_v47 }
 0x274   :  { %v209_v55 = vrot.slane %v208_v52, 1 }
 0x276   :  { %v210_v58 = vadd.f32 %v209_v55, %v208_v52 }
 0x278   :  { %v184_v49 = vpop.xlane.xlu1 %183 }
 0x279   :  { %v185_v50 = vrot.slane %v184_v49, 4 }
 0x27b   :  { %v186_v51 = vadd.f32 %v185_v50, %v184_v49 }
 0x27d   :  { %v187_v53 = vrot.slane %v186_v51, 2 }
 0x27f   :  { %v188_v54 = vadd.f32 %v187_v53, %v186_v51 }
 0x281   :  { %v189_v56 = vrot.slane %v188_v54, 1 }
 0x283   :  { %v190_v57 = vadd.f32 %v189_v56, %v188_v54 }
 0x285   :  { %238 = vpush %v190_v57 }
 0x286   :  { %240 = vpush %v210_v58 }
 0x2b6   :  { %s239_s26 = spop %238 }
 0x2b7   :  { %v216_v59 = vstv %s239_s26  ;;  %s241_s29 = spop %240 }
 0x2b8   :  { %v214_v60 = vstv %s241_s29 }
 0x2b9   :  { %v215_v61 = vsel %vm213_vm5, %v214_v60, 0.0 }
 0x2ba   :  { %v217_v62 = vsel %vm212_vm6, %v216_v59, %v215_v61 }
 0x2bb   :  { %218 = vst [vmem:[#allocation8] sm:$0x1] %v217_v62 }
 0x2bc   :  { %305 = shalt.err (!%p302_p12)
}
 0x2bd   :  { %s306_s6 = scalar_lea.hbm %s438_s2, 16 }
 0x2be   :  { %p307_p13 = scmp.ne.s32.totalorder %s438_s2, %s306_s6  ;;  %p310_p0 = scmp.lt.u32.totalorder %s306_s6, %s438_s2 }
 0x2c0   :  { %p312_p1 = pnand %p310_p0, %p307_p13 }
 0x2c2   :  { %315 = shalt.err (!%p312_p1)
}
 0x2c3   :  { %228 = dma.vmem_to_hbm [thread:$0]  %s226_s28, 16, %s438_s2, [#allocation7]  }
 0x2c4   :  { %318 = dma.done.wait [#allocation7], 16  }
 0x2c5   :  { %319 = vsyncadd [#allocation7], 4294967280 }
 0x2c6   :  { %232 = vsyncpa [#allocation6], 1 }
 0x2c7   :  { %233 = vsyncpa [#allocation7], 1 }

</bundles_post_ra>
